<compile_context>
chip_gen: v5e
topology: v5e:2x2
jax: 0.10.0
libtpu: 0.0.40
codegen_flags: <defaults>
</compile_context>

<pallas_src>
import functools

import jax
import jax.numpy as jnp
from jax.experimental import pallas as pl
from jax.experimental.pallas import tpu as pltpu


# ----------------------------- Pallas kernels ------------------------------ #

def _layer_kernel(x_ref,
                  ln1g_ref, ln1b_ref,
                  wqkv_ref, bqkv_ref,
                  wout_ref, bout_ref,
                  ln2g_ref, ln2b_ref,
                  wfc1_ref, bfc1_ref,
                  wfc2_ref, bfc2_ref,
                  o_ref, *, n_heads, sm_scale):
    """One fused CLIP text-transformer layer for one class prompt.

    pre-LN multi-head causal attention + residual, then pre-LN QuickGELU MLP +
    residual.  Residual stream kept in f32; matmul operands in bf16.
    """
    x = x_ref[0]                                   # (S, d) f32 residual stream
    S, d = x.shape
    Dh = d // n_heads

    def _ln(v, g, b):
        mu = jnp.mean(v, axis=-1, keepdims=True)
        var = jnp.mean((v - mu) ** 2, axis=-1, keepdims=True)
        return (v - mu) * jax.lax.rsqrt(var + 1e-5) * g + b

    # --- multi-head causal self-attention ---------------------------------- #
    y = _ln(x, ln1g_ref[...], ln1b_ref[...])
    qkv = jnp.dot(y.astype(jnp.bfloat16), wqkv_ref[...],
                  preferred_element_type=jnp.float32) + bqkv_ref[...]      # (S, 3d)
    q = qkv[:, 0 * d:1 * d]
    k = qkv[:, 1 * d:2 * d]
    v = qkv[:, 2 * d:3 * d]

    row = jax.lax.broadcasted_iota(jnp.int32, (S, S), 0)
    col = jax.lax.broadcasted_iota(jnp.int32, (S, S), 1)
    causal = col <= row

    heads = []
    for h in range(n_heads):                       # static loop (H is small)
        qh = q[:, h * Dh:(h + 1) * Dh].astype(jnp.bfloat16)
        kh = k[:, h * Dh:(h + 1) * Dh].astype(jnp.bfloat16)
        vh = v[:, h * Dh:(h + 1) * Dh].astype(jnp.bfloat16)
        s = jax.lax.dot_general(qh, kh, (((1,), (1,)), ((), ())),
                                preferred_element_type=jnp.float32) * sm_scale
        s = jnp.where(causal, s, -1e30)            # causal mask (CLIP text enc.)
        m = jnp.max(s, axis=-1, keepdims=True)
        p = jnp.exp(s - m)
        p = p * pl.reciprocal(jnp.sum(p, axis=-1, keepdims=True), approx=True)
        heads.append(jnp.dot(p.astype(jnp.bfloat16), vh,
                             preferred_element_type=jnp.float32))
    attn = jnp.concatenate(heads, axis=-1)         # (S, d) lane-dense
    attn = jnp.dot(attn.astype(jnp.bfloat16), wout_ref[...],
                   preferred_element_type=jnp.float32) + bout_ref[...]
    x = x + attn

    # --- MLP block (QuickGELU, as in CLIP) ---------------------------------- #
    y2 = _ln(x, ln2g_ref[...], ln2b_ref[...])
    hdd = jnp.dot(y2.astype(jnp.bfloat16), wfc1_ref[...],
                  preferred_element_type=jnp.float32) + bfc1_ref[...]
    hdd = hdd * jax.nn.sigmoid(1.702 * hdd)
    mlp = jnp.dot(hdd.astype(jnp.bfloat16), wfc2_ref[...],
                  preferred_element_type=jnp.float32) + bfc2_ref[...]
    o_ref[0] = x + mlp


def pallas_transformer_layer(x, lyr, *, n_heads):
    """x: (n_cls, S, d) f32 -> (n_cls, S, d) f32; one fused call per layer."""
    n_cls, S, d = x.shape
    Dh = d // n_heads

    weights = [
        lyr["ln1_g"].reshape(1, d), lyr["ln1_b"].reshape(1, d),
        lyr["w_qkv"].astype(jnp.bfloat16), lyr["b_qkv"].reshape(1, -1),
        lyr["w_out"].astype(jnp.bfloat16), lyr["b_out"].reshape(1, -1),
        lyr["ln2_g"].reshape(1, d), lyr["ln2_b"].reshape(1, d),
        lyr["w_fc1"].astype(jnp.bfloat16), lyr["b_fc1"].reshape(1, -1),
        lyr["w_fc2"].astype(jnp.bfloat16), lyr["b_fc2"].reshape(1, -1),
    ]
    x_spec = pl.BlockSpec((1, S, d), lambda i: (i, 0, 0))
    # constant index_map -> weights stay resident in VMEM across grid steps
    w_specs = [pl.BlockSpec(w.shape, lambda i: (0, 0)) for w in weights]

    flops = int(2 * n_cls * S * (d * 3 * d            # qkv proj
                                 + 2 * n_heads * S * Dh   # scores + p@v
                                 + d * d                  # out proj
                                 + 2 * d * 4 * d))        # fc1 + fc2
    transcendentals = int(n_cls * (n_heads * S * S + S * 4 * d))
    bytes_accessed = int(2 * n_cls * S * d * 4
                         + 2 * (3 * d * d + d * d + 8 * d * d)   # bf16 weights
                         + 4 * (3 * d + d + 4 * d + d + 4 * d))  # f32 biases/LN

    return pl.pallas_call(
        functools.partial(_layer_kernel, n_heads=n_heads, sm_scale=Dh ** -0.5),
        grid=(n_cls,),
        in_specs=[x_spec] + w_specs,
        out_specs=x_spec,
        out_shape=jax.ShapeDtypeStruct((n_cls, S, d), jnp.float32),
        compiler_params=pltpu.CompilerParams(
            dimension_semantics=("parallel",),
            vmem_limit_bytes=32 * 1024 * 1024),
        cost_estimate=pl.CostEstimate(
            flops=flops, transcendentals=transcendentals,
            bytes_accessed=bytes_accessed),
    )(x, *weights)


def _ln_proj_kernel(x_ref, g_ref, b_ref, wproj_ref, o_ref):
    """ln_final + text_projection on the EOT rows only."""
    x = x_ref[...]                                 # (n_cls, d) f32
    mu = jnp.mean(x, axis=-1, keepdims=True)
    var = jnp.mean((x - mu) ** 2, axis=-1, keepdims=True)
    xn = (x - mu) * jax.lax.rsqrt(var + 1e-5) * g_ref[...] + b_ref[...]
    o_ref[...] = jnp.dot(xn.astype(jnp.bfloat16), wproj_ref[...],
                         preferred_element_type=jnp.float32)


def pallas_ln_project(eot_feat, gamma, beta, w_proj):
    n_cls, d = eot_feat.shape
    proj_dim = w_proj.shape[1]
    return pl.pallas_call(
        _ln_proj_kernel,
        out_shape=jax.ShapeDtypeStruct((n_cls, proj_dim), jnp.float32),
    )(eot_feat, gamma.reshape(1, d), beta.reshape(1, d),
      w_proj.astype(jnp.bfloat16))


def _head_kernel(img_ref, txt_ref, scale_ref, o_ref):
    img = img_ref[...].astype(jnp.float32)
    txt = txt_ref[...].astype(jnp.float32)
    img = img * jax.lax.rsqrt(jnp.sum(img * img, axis=-1, keepdims=True) + 1e-12)
    txt = txt * jax.lax.rsqrt(jnp.sum(txt * txt, axis=-1, keepdims=True) + 1e-12)
    # contract last dims of both operands: no materialized transpose of txt
    logits = jax.lax.dot_general(
        img.astype(jnp.bfloat16), txt.astype(jnp.bfloat16),
        (((1,), (1,)), ((), ())), preferred_element_type=jnp.float32)
    o_ref[...] = logits * scale_ref[0]


def pallas_clip_head(image_features, text_features, logit_scale_exp):
    B = image_features.shape[0]
    C = text_features.shape[0]
    return pl.pallas_call(
        _head_kernel,
        out_shape=jax.ShapeDtypeStruct((B, C), jnp.float32),
        in_specs=[
            pl.BlockSpec(memory_space=pltpu.MemorySpace.VMEM),
            pl.BlockSpec(memory_space=pltpu.MemorySpace.VMEM),
            pl.BlockSpec(memory_space=pltpu.MemorySpace.SMEM),
        ],
        out_specs=pl.BlockSpec(memory_space=pltpu.MemorySpace.VMEM),
    )(image_features, text_features, logit_scale_exp.reshape(1))


# ------------------------- CoopClassifier in JAX --------------------------- #

def init_params(key, *, n_cls, n_ctx, d, n_heads, n_layers, proj_dim):
    ks = iter(jax.random.split(key, 64))
    std = 0.02

    def nrm(shape, scale=std):
        return scale * jax.random.normal(next(ks), shape, dtype=jnp.float32)

    seq_len = 1 + n_ctx + 1 + 1 + 1  # SOS + ctx + class tok + EOT + pad
    params = {
        "ctx": nrm((n_ctx, d)),                     # learned CoOp context (shared)
        "sos_emb": nrm((d,)),
        "cls_emb": nrm((n_cls, d)),                 # one embedded name token per class
        "eot_emb": nrm((d,)),
        "pos_emb": nrm((seq_len, d), 0.01),
        "ln_final_g": jnp.ones((d,), jnp.float32),
        "ln_final_b": jnp.zeros((d,), jnp.float32),
        "text_projection": nrm((d, proj_dim), d ** -0.5),
        "logit_scale": jnp.asarray(jnp.log(1.0 / 0.07), jnp.float32),
        "layers": [],
    }
    for _ in range(n_layers):
        params["layers"].append({
            "ln1_g": jnp.ones((d,), jnp.float32), "ln1_b": jnp.zeros((d,), jnp.float32),
            "w_qkv": nrm((d, 3 * d)), "b_qkv": jnp.zeros((3 * d,), jnp.float32),
            "w_out": nrm((d, d)), "b_out": jnp.zeros((d,), jnp.float32),
            "ln2_g": jnp.ones((d,), jnp.float32), "ln2_b": jnp.zeros((d,), jnp.float32),
            "w_fc1": nrm((d, 4 * d)), "b_fc1": jnp.zeros((4 * d,), jnp.float32),
            "w_fc2": nrm((4 * d, d)), "b_fc2": jnp.zeros((d,), jnp.float32),
        })
    static = {"n_heads": n_heads, "eot_idx": 1 + n_ctx + 1}
    return params, static


def prompt_text_encoder(params, *, n_heads, eot_idx):
    """PromptLearningTextEncoder forward: build prompts, run CLIP text transformer."""
    n_cls, d = params["cls_emb"].shape
    n_ctx = params["ctx"].shape[0]

    # Build prompt embeddings: [SOS, ctx..., class, EOT, pad]  (cheap, done once)
    sos = jnp.broadcast_to(params["sos_emb"][None, None, :], (n_cls, 1, d))
    ctx = jnp.broadcast_to(params["ctx"][None, :, :], (n_cls, n_ctx, d))
    cls_t = params["cls_emb"][:, None, :]
    eot = jnp.broadcast_to(params["eot_emb"][None, None, :], (n_cls, 1, d))
    pad = jnp.zeros((n_cls, 1, d), jnp.float32)
    prompts = jnp.concatenate([sos, ctx, cls_t, eot, pad], axis=1)       # (n_cls, S, d)

    x = prompts + params["pos_emb"][None, :, :]
    for lyr in params["layers"]:
        x = pallas_transformer_layer(x, lyr, n_heads=n_heads)

    # ln_final + text_projection only on the EOT rows (S-fold less LN work)
    eot_feat = x[:, eot_idx, :]                                          # (n_cls, d)
    text_features = pallas_ln_project(eot_feat, params["ln_final_g"],
                                      params["ln_final_b"],
                                      params["text_projection"])
    return text_features


def coop_classifier_forward(params, image_features, *, n_heads, eot_idx):
    text_features = prompt_text_encoder(params, n_heads=n_heads, eot_idx=eot_idx)
    # CLIP clamps the learned temperature so exp(logit_scale) <= 100
    scale = jnp.minimum(jnp.exp(params["logit_scale"]), 100.0)
    logits = pallas_clip_head(image_features, text_features, scale)
    return logits


# ---------------------------------- main ----------------------------------- #

if __name__ == "__main__":
    key = jax.random.PRNGKey(0)
    k_params, k_img = jax.random.split(key)

    n_cls, n_ctx, d, n_heads, n_layers, proj_dim = 4, 4, 32, 2, 2, 32
    batch = 2

    params, static = init_params(k_params, n_cls=n_cls, n_ctx=n_ctx, d=d,
                                 n_heads=n_heads, n_layers=n_layers,
                                 proj_dim=proj_dim)
    image_features = jax.random.normal(k_img, (batch, proj_dim), dtype=jnp.float32)

    fwd = jax.jit(functools.partial(coop_classifier_forward,
                                    n_heads=static["n_heads"],
                                    eot_idx=static["eot_idx"]))
    logits = fwd(params, image_features)
    logits = jax.block_until_ready(logits)
    assert logits.shape == (batch, n_cls) and logits.dtype == jnp.float32
    assert bool(jnp.all(jnp.isfinite(logits)))
    print("KERNEL_OK")
</pallas_src>

<mosaic_0001>
module attributes {stable_mosaic.version = 11 : i64} {
  func.func @_ln_proj_kernel(%arg0: memref<4x32xf32, #tpu.memory_space<vmem>>, %arg1: memref<1x32xf32, #tpu.memory_space<vmem>>, %arg2: memref<1x32xf32, #tpu.memory_space<vmem>>, %arg3: memref<32x32xbf16, #tpu.memory_space<vmem>>, %arg4: memref<4x32xf32, #tpu.memory_space<vmem>>) attributes {dimension_semantics = [], scalar_prefetch = 0 : i64, scratch_operands = 0 : i64, tpu.core_type = #tpu.core_type<tc>} {
    %c0 = arith.constant 0 : index
    %c0_0 = arith.constant 0 : index
    %0 = vector.load %arg0[%c0, %c0_0] : memref<4x32xf32, #tpu.memory_space<vmem>>, vector<4x32xf32>
    %cst = arith.constant dense<0.000000e+00> : vector<4xf32>
    %1 = vector.multi_reduction <add>, %0, %cst [1] : vector<4x32xf32> to vector<4xf32>
    %2 = vector.shape_cast %1 : vector<4xf32> to vector<4x1xf32>
    %cst_1 = arith.constant 3.200000e+01 : f32
    %3 = vector.broadcast %cst_1 : f32 to vector<4x1xf32>
    %4 = arith.divf %2, %3 : vector<4x1xf32>
    %5 = vector.broadcast %4 : vector<4x1xf32> to vector<4x32xf32>
    %6 = arith.subf %0, %5 : vector<4x32xf32>
    %7 = arith.mulf %6, %6 : vector<4x32xf32>
    %cst_2 = arith.constant dense<0.000000e+00> : vector<4xf32>
    %8 = vector.multi_reduction <add>, %7, %cst_2 [1] : vector<4x32xf32> to vector<4xf32>
    %9 = vector.shape_cast %8 : vector<4xf32> to vector<4x1xf32>
    %cst_3 = arith.constant 3.200000e+01 : f32
    %10 = vector.broadcast %cst_3 : f32 to vector<4x1xf32>
    %11 = arith.divf %9, %10 : vector<4x1xf32>
    %12 = vector.broadcast %4 : vector<4x1xf32> to vector<4x32xf32>
    %13 = arith.subf %0, %12 : vector<4x32xf32>
    %cst_4 = arith.constant 9.99999974E-6 : f32
    %14 = vector.broadcast %cst_4 : f32 to vector<4x1xf32>
    %15 = arith.addf %11, %14 : vector<4x1xf32>
    %16 = math.rsqrt %15 : vector<4x1xf32>
    %17 = vector.broadcast %16 : vector<4x1xf32> to vector<4x32xf32>
    %18 = arith.mulf %13, %17 : vector<4x32xf32>
    %c0_5 = arith.constant 0 : index
    %c0_6 = arith.constant 0 : index
    %19 = vector.load %arg1[%c0_5, %c0_6] : memref<1x32xf32, #tpu.memory_space<vmem>>, vector<1x32xf32>
    %20 = vector.broadcast %19 : vector<1x32xf32> to vector<4x32xf32>
    %21 = arith.mulf %18, %20 : vector<4x32xf32>
    %c0_7 = arith.constant 0 : index
    %c0_8 = arith.constant 0 : index
    %22 = vector.load %arg2[%c0_7, %c0_8] : memref<1x32xf32, #tpu.memory_space<vmem>>, vector<1x32xf32>
    %23 = vector.broadcast %22 : vector<1x32xf32> to vector<4x32xf32>
    %24 = arith.addf %21, %23 : vector<4x32xf32>
    %25 = arith.truncf %24 : vector<4x32xf32> to vector<4x32xbf16>
    %c0_9 = arith.constant 0 : index
    %c0_10 = arith.constant 0 : index
    %26 = vector.load %arg3[%c0_9, %c0_10] : memref<32x32xbf16, #tpu.memory_space<vmem>>, vector<32x32xbf16>
    %cst_11 = arith.constant dense<0.000000e+00> : vector<4x32xf32>
    %27 = tpu.matmul %25, %26, %cst_11 {dimension_numbers = #tpu.dot_dimension_numbers<[1], [0], [0], [1], [0, 0, 1, 1], [], []>} : vector<4x32xbf16>, vector<32x32xbf16>, vector<4x32xf32> -> vector<4x32xf32>
    %c0_12 = arith.constant 0 : index
    %c0_13 = arith.constant 0 : index
    %28 = vector.load %arg4[%c0_12, %c0_13] : memref<4x32xf32, #tpu.memory_space<vmem>>, vector<4x32xf32>
    tpu.vector_store %arg4[%c0_12, %c0_13], %27 {strides = array<i32>} : memref<4x32xf32, #tpu.memory_space<vmem>>, vector<4x32xf32>,
    return
  }
}

module attributes {stable_mosaic.version = 11 : i64} {
  func.func @_head_kernel(%arg0: memref<2x32xf32, #tpu.memory_space<vmem>>, %arg1: memref<4x32xf32, #tpu.memory_space<vmem>>, %arg2: memref<1xf32, #tpu.memory_space<smem>>, %arg3: memref<2x4xf32, #tpu.memory_space<vmem>>) attributes {dimension_semantics = [], scalar_prefetch = 0 : i64, scratch_operands = 0 : i64, tpu.core_type = #tpu.core_type<tc>} {
    %c0 = arith.constant 0 : index
    %c0_0 = arith.constant 0 : index
    %0 = vector.load %arg0[%c0, %c0_0] : memref<2x32xf32, #tpu.memory_space<vmem>>, vector<2x32xf32>
    %c0_1 = arith.constant 0 : index
    %c0_2 = arith.constant 0 : index
    %1 = vector.load %arg1[%c0_1, %c0_2] : memref<4x32xf32, #tpu.memory_space<vmem>>, vector<4x32xf32>
    %2 = arith.mulf %0, %0 : vector<2x32xf32>
    %cst = arith.constant dense<0.000000e+00> : vector<2xf32>
    %3 = vector.multi_reduction <add>, %2, %cst [1] : vector<2x32xf32> to vector<2xf32>
    %4 = vector.shape_cast %3 : vector<2xf32> to vector<2x1xf32>
    %cst_3 = arith.constant 9.99999996E-13 : f32
    %5 = vector.broadcast %cst_3 : f32 to vector<2x1xf32>
    %6 = arith.addf %4, %5 : vector<2x1xf32>
    %7 = math.rsqrt %6 : vector<2x1xf32>
    %8 = vector.broadcast %7 : vector<2x1xf32> to vector<2x32xf32>
    %9 = arith.mulf %0, %8 : vector<2x32xf32>
    %10 = arith.mulf %1, %1 : vector<4x32xf32>
    %cst_4 = arith.constant dense<0.000000e+00> : vector<4xf32>
    %11 = vector.multi_reduction <add>, %10, %cst_4 [1] : vector<4x32xf32> to vector<4xf32>
    %12 = vector.shape_cast %11 : vector<4xf32> to vector<4x1xf32>
    %cst_5 = arith.constant 9.99999996E-13 : f32
    %13 = vector.broadcast %cst_5 : f32 to vector<4x1xf32>
    %14 = arith.addf %12, %13 : vector<4x1xf32>
    %15 = math.rsqrt %14 : vector<4x1xf32>
    %16 = vector.broadcast %15 : vector<4x1xf32> to vector<4x32xf32>
    %17 = arith.mulf %1, %16 : vector<4x32xf32>
    %18 = arith.truncf %9 : vector<2x32xf32> to vector<2x32xbf16>
    %19 = arith.truncf %17 : vector<4x32xf32> to vector<4x32xbf16>
    %cst_6 = arith.constant dense<0.000000e+00> : vector<2x4xf32>
    %20 = tpu.matmul %18, %19, %cst_6 {dimension_numbers = #tpu.dot_dimension_numbers<[1], [1], [0], [0], [0, 0, 1, 0], [], []>} : vector<2x32xbf16>, vector<4x32xbf16>, vector<2x4xf32> -> vector<2x4xf32>
    %c0_7 = arith.constant 0 : index
    %21 = memref.load %arg2[%c0_7] : memref<1xf32, #tpu.memory_space<smem>>
    %22 = vector.broadcast %21 : f32 to vector<2x4xf32>
    %23 = arith.mulf %20, %22 : vector<2x4xf32>
    %c0_8 = arith.constant 0 : index
    %c0_9 = arith.constant 0 : index
    %24 = vector.load %arg3[%c0_8, %c0_9] : memref<2x4xf32, #tpu.memory_space<vmem>>, vector<2x4xf32>
    tpu.vector_store %arg3[%c0_8, %c0_9], %23 {strides = array<i32>} : memref<2x4xf32, #tpu.memory_space<vmem>>, vector<2x4xf32>,
    return
  }
}

module attributes {stable_mosaic.version = 11 : i64} {
  func.func @_layer_kernel(%arg0: i32, %arg1: memref<1x8x32xf32, #tpu.memory_space<vmem>>, %arg2: memref<1x32xf32, #tpu.memory_space<vmem>>, %arg3: memref<1x32xf32, #tpu.memory_space<vmem>>, %arg4: memref<32x96xbf16, #tpu.memory_space<vmem>>, %arg5: memref<1x96xf32, #tpu.memory_space<vmem>>, %arg6: memref<32x32xbf16, #tpu.memory_space<vmem>>, %arg7: memref<1x32xf32, #tpu.memory_space<vmem>>, %arg8: memref<1x32xf32, #tpu.memory_space<vmem>>, %arg9: memref<1x32xf32, #tpu.memory_space<vmem>>, %arg10: memref<32x128xbf16, #tpu.memory_space<vmem>>, %arg11: memref<1x128xf32, #tpu.memory_space<vmem>>, %arg12: memref<128x32xbf16, #tpu.memory_space<vmem>>, %arg13: memref<1x32xf32, #tpu.memory_space<vmem>>, %arg14: memref<1x8x32xf32, #tpu.memory_space<vmem>>) attributes {dimension_semantics = [#tpu.dimension_semantics<parallel>], iteration_bounds = array<i64: 4>, scalar_prefetch = 0 : i64, scratch_operands = 0 : i64, tpu.core_type = #tpu.core_type<tc>, window_params = [{transform_indices = @transform_0, window_bounds = array<i64: 1, 8, 32>}, {pipeline_mode = #tpu.pipeline_mode<synchronous>, transform_indices = @transform_1, window_bounds = array<i64: 1, 32>}, {pipeline_mode = #tpu.pipeline_mode<synchronous>, transform_indices = @transform_2, window_bounds = array<i64: 1, 32>}, {pipeline_mode = #tpu.pipeline_mode<synchronous>, transform_indices = @transform_3, window_bounds = array<i64: 32, 96>}, {pipeline_mode = #tpu.pipeline_mode<synchronous>, transform_indices = @transform_4, window_bounds = array<i64: 1, 96>}, {pipeline_mode = #tpu.pipeline_mode<synchronous>, transform_indices = @transform_5, window_bounds = array<i64: 32, 32>}, {pipeline_mode = #tpu.pipeline_mode<synchronous>, transform_indices = @transform_6, window_bounds = array<i64: 1, 32>}, {pipeline_mode = #tpu.pipeline_mode<synchronous>, transform_indices = @transform_7, window_bounds = array<i64: 1, 32>}, {pipeline_mode = #tpu.pipeline_mode<synchronous>, transform_indices = @transform_8, window_bounds = array<i64: 1, 32>}, {pipeline_mode = #tpu.pipeline_mode<synchronous>, transform_indices = @transform_9, window_bounds = array<i64: 32, 128>}, {pipeline_mode = #tpu.pipeline_mode<synchronous>, transform_indices = @transform_10, window_bounds = array<i64: 1, 128>}, {pipeline_mode = #tpu.pipeline_mode<synchronous>, transform_indices = @transform_11, window_bounds = array<i64: 128, 32>}, {pipeline_mode = #tpu.pipeline_mode<synchronous>, transform_indices = @transform_12, window_bounds = array<i64: 1, 32>}, {transform_indices = @transform_13, window_bounds = array<i64: 1, 8, 32>}]} {
    %c0 = arith.constant 0 : index
    %c0_0 = arith.constant 0 : index
    %c0_1 = arith.constant 0 : index
    %0 = vector.load %arg1[%c0, %c0_0, %c0_1] : memref<1x8x32xf32, #tpu.memory_space<vmem>>, vector<1x8x32xf32>
    %1 = vector.shape_cast %0 : vector<1x8x32xf32> to vector<8x32xf32>
    %c0_2 = arith.constant 0 : index
    %c0_3 = arith.constant 0 : index
    %2 = vector.load %arg2[%c0_2, %c0_3] : memref<1x32xf32, #tpu.memory_space<vmem>>, vector<1x32xf32>
    %c0_4 = arith.constant 0 : index
    %c0_5 = arith.constant 0 : index
    %3 = vector.load %arg3[%c0_4, %c0_5] : memref<1x32xf32, #tpu.memory_space<vmem>>, vector<1x32xf32>
    %cst = arith.constant dense<0.000000e+00> : vector<8xf32>
    %4 = vector.multi_reduction <add>, %1, %cst [1] : vector<8x32xf32> to vector<8xf32>
    %5 = vector.shape_cast %4 : vector<8xf32> to vector<8x1xf32>
    %cst_6 = arith.constant 3.200000e+01 : f32
    %6 = vector.broadcast %cst_6 : f32 to vector<8x1xf32>
    %7 = arith.divf %5, %6 : vector<8x1xf32>
    %8 = vector.broadcast %7 : vector<8x1xf32> to vector<8x32xf32>
    %9 = arith.subf %1, %8 : vector<8x32xf32>
    %10 = arith.mulf %9, %9 : vector<8x32xf32>
    %cst_7 = arith.constant dense<0.000000e+00> : vector<8xf32>
    %11 = vector.multi_reduction <add>, %10, %cst_7 [1] : vector<8x32xf32> to vector<8xf32>
    %12 = vector.shape_cast %11 : vector<8xf32> to vector<8x1xf32>
    %cst_8 = arith.constant 3.200000e+01 : f32
    %13 = vector.broadcast %cst_8 : f32 to vector<8x1xf32>
    %14 = arith.divf %12, %13 : vector<8x1xf32>
    %15 = vector.broadcast %7 : vector<8x1xf32> to vector<8x32xf32>
    %16 = arith.subf %1, %15 : vector<8x32xf32>
    %cst_9 = arith.constant 9.99999974E-6 : f32
    %17 = vector.broadcast %cst_9 : f32 to vector<8x1xf32>
    %18 = arith.addf %14, %17 : vector<8x1xf32>
    %19 = math.rsqrt %18 : vector<8x1xf32>
    %20 = vector.broadcast %19 : vector<8x1xf32> to vector<8x32xf32>
    %21 = arith.mulf %16, %20 : vector<8x32xf32>
    %22 = vector.broadcast %2 : vector<1x32xf32> to vector<8x32xf32>
    %23 = arith.mulf %21, %22 : vector<8x32xf32>
    %24 = vector.broadcast %3 : vector<1x32xf32> to vector<8x32xf32>
    %25 = arith.addf %23, %24 : vector<8x32xf32>
    %26 = arith.truncf %25 : vector<8x32xf32> to vector<8x32xbf16>
    %c0_10 = arith.constant 0 : index
    %c0_11 = arith.constant 0 : index
    %27 = vector.load %arg4[%c0_10, %c0_11] : memref<32x96xbf16, #tpu.memory_space<vmem>>, vector<32x96xbf16>
    %cst_12 = arith.constant dense<0.000000e+00> : vector<8x96xf32>
    %28 = tpu.matmul %26, %27, %cst_12 {dimension_numbers = #tpu.dot_dimension_numbers<[1], [0], [0], [1], [0, 0, 1, 1], [], []>} : vector<8x32xbf16>, vector<32x96xbf16>, vector<8x96xf32> -> vector<8x96xf32>
    %c0_13 = arith.constant 0 : index
    %c0_14 = arith.constant 0 : index
    %29 = vector.load %arg5[%c0_13, %c0_14] : memref<1x96xf32, #tpu.memory_space<vmem>>, vector<1x96xf32>
    %30 = vector.broadcast %29 : vector<1x96xf32> to vector<8x96xf32>
    %31 = arith.addf %28, %30 : vector<8x96xf32>
    %32 = vector.extract_strided_slice %31 {offsets = [0, 0], sizes = [8, 32], strides = [1, 1]} : vector<8x96xf32> to vector<8x32xf32>
    %33 = vector.extract_strided_slice %31 {offsets = [0, 32], sizes = [8, 32], strides = [1, 1]} : vector<8x96xf32> to vector<8x32xf32>
    %34 = vector.extract_strided_slice %31 {offsets = [0, 64], sizes = [8, 32], strides = [1, 1]} : vector<8x96xf32> to vector<8x32xf32>
    %35 = tpu.iota {dimensions = array<i32: 0>} : vector<8x8xi32>
    %36 = tpu.iota {dimensions = array<i32: 1>} : vector<8x8xi32>
    %37 = arith.cmpi sle, %36, %35 : vector<8x8xi32>
    %38 = vector.extract_strided_slice %32 {offsets = [0, 0], sizes = [8, 16], strides = [1, 1]} : vector<8x32xf32> to vector<8x16xf32>
    %39 = arith.truncf %38 : vector<8x16xf32> to vector<8x16xbf16>
    %40 = vector.extract_strided_slice %33 {offsets = [0, 0], sizes = [8, 16], strides = [1, 1]} : vector<8x32xf32> to vector<8x16xf32>
    %41 = arith.truncf %40 : vector<8x16xf32> to vector<8x16xbf16>
    %42 = vector.extract_strided_slice %34 {offsets = [0, 0], sizes = [8, 16], strides = [1, 1]} : vector<8x32xf32> to vector<8x16xf32>
    %43 = arith.truncf %42 : vector<8x16xf32> to vector<8x16xbf16>
    %cst_15 = arith.constant dense<0.000000e+00> : vector<8x8xf32>
    %44 = tpu.matmul %39, %41, %cst_15 {dimension_numbers = #tpu.dot_dimension_numbers<[1], [1], [0], [0], [0, 0, 1, 0], [], []>} : vector<8x16xbf16>, vector<8x16xbf16>, vector<8x8xf32> -> vector<8x8xf32>
    %cst_16 = arith.constant 2.500000e-01 : f32
    %45 = vector.broadcast %cst_16 : f32 to vector<8x8xf32>
    %46 = arith.mulf %44, %45 : vector<8x8xf32>
    %cst_17 = arith.constant -1.000000e+30 : f32
    %47 = vector.broadcast %cst_17 : f32 to vector<8x8xf32>
    %48 = arith.select %37, %46, %47 : vector<8x8xi1>, vector<8x8xf32>
    %cst_18 = arith.constant dense<0xFF800000> : vector<8xf32>
    %49 = vector.multi_reduction <maximumf>, %48, %cst_18 [1] : vector<8x8xf32> to vector<8xf32>
    %50 = vector.shape_cast %49 : vector<8xf32> to vector<8x1xf32>
    %51 = vector.broadcast %50 : vector<8x1xf32> to vector<8x8xf32>
    %52 = arith.subf %48, %51 : vector<8x8xf32>
    %53 = math.exp %52 : vector<8x8xf32>
    %cst_19 = arith.constant dense<0.000000e+00> : vector<8xf32>
    %54 = vector.multi_reduction <add>, %53, %cst_19 [1] : vector<8x8xf32> to vector<8xf32>
    %55 = vector.shape_cast %54 : vector<8xf32> to vector<8x1xf32>
    %56 = tpu.reciprocal %55 {approx = true} : vector<8x1xf32> -> vector<8x1xf32>
    %57 = vector.broadcast %56 : vector<8x1xf32> to vector<8x8xf32>
    %58 = arith.mulf %53, %57 : vector<8x8xf32>
    %59 = arith.truncf %58 : vector<8x8xf32> to vector<8x8xbf16>
    %cst_20 = arith.constant dense<0.000000e+00> : vector<8x16xf32>
    %60 = tpu.matmul %59, %43, %cst_20 {dimension_numbers = #tpu.dot_dimension_numbers<[1], [0], [0], [1], [0, 0, 1, 1], [], []>} : vector<8x8xbf16>, vector<8x16xbf16>, vector<8x16xf32> -> vector<8x16xf32>
    %61 = vector.extract_strided_slice %32 {offsets = [0, 16], sizes = [8, 16], strides = [1, 1]} : vector<8x32xf32> to vector<8x16xf32>
    %62 = arith.truncf %61 : vector<8x16xf32> to vector<8x16xbf16>
    %63 = vector.extract_strided_slice %33 {offsets = [0, 16], sizes = [8, 16], strides = [1, 1]} : vector<8x32xf32> to vector<8x16xf32>
    %64 = arith.truncf %63 : vector<8x16xf32> to vector<8x16xbf16>
    %65 = vector.extract_strided_slice %34 {offsets = [0, 16], sizes = [8, 16], strides = [1, 1]} : vector<8x32xf32> to vector<8x16xf32>
    %66 = arith.truncf %65 : vector<8x16xf32> to vector<8x16xbf16>
    %cst_21 = arith.constant dense<0.000000e+00> : vector<8x8xf32>
    %67 = tpu.matmul %62, %64, %cst_21 {dimension_numbers = #tpu.dot_dimension_numbers<[1], [1], [0], [0], [0, 0, 1, 0], [], []>} : vector<8x16xbf16>, vector<8x16xbf16>, vector<8x8xf32> -> vector<8x8xf32>
    %cst_22 = arith.constant 2.500000e-01 : f32
    %68 = vector.broadcast %cst_22 : f32 to vector<8x8xf32>
    %69 = arith.mulf %67, %68 : vector<8x8xf32>
    %cst_23 = arith.constant -1.000000e+30 : f32
    %70 = vector.broadcast %cst_23 : f32 to vector<8x8xf32>
    %71 = arith.select %37, %69, %70 : vector<8x8xi1>, vector<8x8xf32>
    %cst_24 = arith.constant dense<0xFF800000> : vector<8xf32>
    %72 = vector.multi_reduction <maximumf>, %71, %cst_24 [1] : vector<8x8xf32> to vector<8xf32>
    %73 = vector.shape_cast %72 : vector<8xf32> to vector<8x1xf32>
    %74 = vector.broadcast %73 : vector<8x1xf32> to vector<8x8xf32>
    %75 = arith.subf %71, %74 : vector<8x8xf32>
    %76 = math.exp %75 : vector<8x8xf32>
    %cst_25 = arith.constant dense<0.000000e+00> : vector<8xf32>
    %77 = vector.multi_reduction <add>, %76, %cst_25 [1] : vector<8x8xf32> to vector<8xf32>
    %78 = vector.shape_cast %77 : vector<8xf32> to vector<8x1xf32>
    %79 = tpu.reciprocal %78 {approx = true} : vector<8x1xf32> -> vector<8x1xf32>
    %80 = vector.broadcast %79 : vector<8x1xf32> to vector<8x8xf32>
    %81 = arith.mulf %76, %80 : vector<8x8xf32>
    %82 = arith.truncf %81 : vector<8x8xf32> to vector<8x8xbf16>
    %cst_26 = arith.constant dense<0.000000e+00> : vector<8x16xf32>
    %83 = tpu.matmul %82, %66, %cst_26 {dimension_numbers = #tpu.dot_dimension_numbers<[1], [0], [0], [1], [0, 0, 1, 1], [], []>} : vector<8x8xbf16>, vector<8x16xbf16>, vector<8x16xf32> -> vector<8x16xf32>
    %84 = tpu.concatenate %60, %83 in 1 : vector<8x16xf32>, vector<8x16xf32> -> vector<8x32xf32>
    %85 = arith.truncf %84 : vector<8x32xf32> to vector<8x32xbf16>
    %c0_27 = arith.constant 0 : index
    %c0_28 = arith.constant 0 : index
    %86 = vector.load %arg6[%c0_27, %c0_28] : memref<32x32xbf16, #tpu.memory_space<vmem>>, vector<32x32xbf16>
    %cst_29 = arith.constant dense<0.000000e+00> : vector<8x32xf32>
    %87 = tpu.matmul %85, %86, %cst_29 {dimension_numbers = #tpu.dot_dimension_numbers<[1], [0], [0], [1], [0, 0, 1, 1], [], []>} : vector<8x32xbf16>, vector<32x32xbf16>, vector<8x32xf32> -> vector<8x32xf32>
    %c0_30 = arith.constant 0 : index
    %c0_31 = arith.constant 0 : index
    %88 = vector.load %arg7[%c0_30, %c0_31] : memref<1x32xf32, #tpu.memory_space<vmem>>, vector<1x32xf32>
    %89 = vector.broadcast %88 : vector<1x32xf32> to vector<8x32xf32>
    %90 = arith.addf %87, %89 : vector<8x32xf32>
    %91 = arith.addf %1, %90 : vector<8x32xf32>
    %c0_32 = arith.constant 0 : index
    %c0_33 = arith.constant 0 : index
    %92 = vector.load %arg8[%c0_32, %c0_33] : memref<1x32xf32, #tpu.memory_space<vmem>>, vector<1x32xf32>
    %c0_34 = arith.constant 0 : index
    %c0_35 = arith.constant 0 : index
    %93 = vector.load %arg9[%c0_34, %c0_35] : memref<1x32xf32, #tpu.memory_space<vmem>>, vector<1x32xf32>
    %cst_36 = arith.constant dense<0.000000e+00> : vector<8xf32>
    %94 = vector.multi_reduction <add>, %91, %cst_36 [1] : vector<8x32xf32> to vector<8xf32>
    %95 = vector.shape_cast %94 : vector<8xf32> to vector<8x1xf32>
    %cst_37 = arith.constant 3.200000e+01 : f32
    %96 = vector.broadcast %cst_37 : f32 to vector<8x1xf32>
    %97 = arith.divf %95, %96 : vector<8x1xf32>
    %98 = vector.broadcast %97 : vector<8x1xf32> to vector<8x32xf32>
    %99 = arith.subf %91, %98 : vector<8x32xf32>
    %100 = arith.mulf %99, %99 : vector<8x32xf32>
    %cst_38 = arith.constant dense<0.000000e+00> : vector<8xf32>
    %101 = vector.multi_reduction <add>, %100, %cst_38 [1] : vector<8x32xf32> to vector<8xf32>
    %102 = vector.shape_cast %101 : vector<8xf32> to vector<8x1xf32>
    %cst_39 = arith.constant 3.200000e+01 : f32
    %103 = vector.broadcast %cst_39 : f32 to vector<8x1xf32>
    %104 = arith.divf %102, %103 : vector<8x1xf32>
    %105 = vector.broadcast %97 : vector<8x1xf32> to vector<8x32xf32>
    %106 = arith.subf %91, %105 : vector<8x32xf32>
    %cst_40 = arith.constant 9.99999974E-6 : f32
    %107 = vector.broadcast %cst_40 : f32 to vector<8x1xf32>
    %108 = arith.addf %104, %107 : vector<8x1xf32>
    %109 = math.rsqrt %108 : vector<8x1xf32>
    %110 = vector.broadcast %109 : vector<8x1xf32> to vector<8x32xf32>
    %111 = arith.mulf %106, %110 : vector<8x32xf32>
    %112 = vector.broadcast %92 : vector<1x32xf32> to vector<8x32xf32>
    %113 = arith.mulf %111, %112 : vector<8x32xf32>
    %114 = vector.broadcast %93 : vector<1x32xf32> to vector<8x32xf32>
    %115 = arith.addf %113, %114 : vector<8x32xf32>
    %116 = arith.truncf %115 : vector<8x32xf32> to vector<8x32xbf16>
    %c0_41 = arith.constant 0 : index
    %c0_42 = arith.constant 0 : index
    %117 = vector.load %arg10[%c0_41, %c0_42] : memref<32x128xbf16, #tpu.memory_space<vmem>>, vector<32x128xbf16>
    %cst_43 = arith.constant dense<0.000000e+00> : vector<8x128xf32>
    %118 = tpu.matmul %116, %117, %cst_43 {dimension_numbers = #tpu.dot_dimension_numbers<[1], [0], [0], [1], [0, 0, 1, 1], [], []>} : vector<8x32xbf16>, vector<32x128xbf16>, vector<8x128xf32> -> vector<8x128xf32>
    %c0_44 = arith.constant 0 : index
    %c0_45 = arith.constant 0 : index
    %119 = vector.load %arg11[%c0_44, %c0_45] : memref<1x128xf32, #tpu.memory_space<vmem>>, vector<1x128xf32>
    %120 = vector.broadcast %119 : vector<1x128xf32> to vector<8x128xf32>
    %121 = arith.addf %118, %120 : vector<8x128xf32>
    %cst_46 = arith.constant 1.702000e+00 : f32
    %122 = vector.broadcast %cst_46 : f32 to vector<8x128xf32>
    %123 = arith.mulf %122, %121 : vector<8x128xf32>
    %124 = arith.negf %123 : vector<8x128xf32>
    %125 = math.exp %124 : vector<8x128xf32>
    %cst_47 = arith.constant 1.000000e+00 : f32
    %126 = vector.broadcast %cst_47 : f32 to vector<8x128xf32>
    %127 = arith.addf %126, %125 : vector<8x128xf32>
    %128 = arith.divf %126, %127 : vector<8x128xf32>
    %129 = arith.mulf %121, %128 : vector<8x128xf32>
    %130 = arith.truncf %129 : vector<8x128xf32> to vector<8x128xbf16>
    %c0_48 = arith.constant 0 : index
    %c0_49 = arith.constant 0 : index
    %131 = vector.load %arg12[%c0_48, %c0_49] : memref<128x32xbf16, #tpu.memory_space<vmem>>, vector<128x32xbf16>
    %cst_50 = arith.constant dense<0.000000e+00> : vector<8x32xf32>
    %132 = tpu.matmul %130, %131, %cst_50 {dimension_numbers = #tpu.dot_dimension_numbers<[1], [0], [0], [1], [0, 0, 1, 1], [], []>} : vector<8x128xbf16>, vector<128x32xbf16>, vector<8x32xf32> -> vector<8x32xf32>
    %c0_51 = arith.constant 0 : index
    %c0_52 = arith.constant 0 : index
    %133 = vector.load %arg13[%c0_51, %c0_52] : memref<1x32xf32, #tpu.memory_space<vmem>>, vector<1x32xf32>
    %134 = vector.broadcast %133 : vector<1x32xf32> to vector<8x32xf32>
    %135 = arith.addf %132, %134 : vector<8x32xf32>
    %136 = arith.addf %91, %135 : vector<8x32xf32>
    %c0_53 = arith.constant 0 : index
    %c0_54 = arith.constant 0 : index
    %c0_55 = arith.constant 0 : index
    %137 = vector.load %arg14[%c0_53, %c0_54, %c0_55] : memref<1x8x32xf32, #tpu.memory_space<vmem>>, vector<1x8x32xf32>
    %138 = vector.shape_cast %137 : vector<1x8x32xf32> to vector<8x32xf32>
    %139 = vector.shape_cast %136 : vector<8x32xf32> to vector<1x8x32xf32>
    tpu.vector_store %arg14[%c0_53, %c0_54, %c0_55], %139 {strides = array<i32>} : memref<1x8x32xf32, #tpu.memory_space<vmem>>, vector<1x8x32xf32>,
    return
  }
  func.func @transform_0(%arg0: i32) -> (i32, i32, i32) {
    %c0_i32 = arith.constant 0 : i32
    %c0_i32_0 = arith.constant 0 : i32
    %c0_i32_1 = arith.constant 0 : i32
    return %arg0, %c0_i32, %c0_i32_0 : i32, i32, i32
  }
  func.func @transform_1(%arg0: i32) -> (i32, i32) {
    %c0_i32 = arith.constant 0 : i32
    %c0_i32_0 = arith.constant 0 : i32
    %c0_i32_1 = arith.constant 0 : i32
    return %c0_i32, %c0_i32_0 : i32, i32
  }
  func.func @transform_2(%arg0: i32) -> (i32, i32) {
    %c0_i32 = arith.constant 0 : i32
    %c0_i32_0 = arith.constant 0 : i32
    %c0_i32_1 = arith.constant 0 : i32
    return %c0_i32, %c0_i32_0 : i32, i32
  }
  func.func @transform_3(%arg0: i32) -> (i32, i32) {
    %c0_i32 = arith.constant 0 : i32
    %c0_i32_0 = arith.constant 0 : i32
    %c0_i32_1 = arith.constant 0 : i32
    return %c0_i32, %c0_i32_0 : i32, i32
  }
  func.func @transform_4(%arg0: i32) -> (i32, i32) {
    %c0_i32 = arith.constant 0 : i32
    %c0_i32_0 = arith.constant 0 : i32
    %c0_i32_1 = arith.constant 0 : i32
    return %c0_i32, %c0_i32_0 : i32, i32
  }
  func.func @transform_5(%arg0: i32) -> (i32, i32) {
    %c0_i32 = arith.constant 0 : i32
    %c0_i32_0 = arith.constant 0 : i32
    %c0_i32_1 = arith.constant 0 : i32
    return %c0_i32, %c0_i32_0 : i32, i32
  }
  func.func @transform_6(%arg0: i32) -> (i32, i32) {
    %c0_i32 = arith.constant 0 : i32
    %c0_i32_0 = arith.constant 0 : i32
    %c0_i32_1 = arith.constant 0 : i32
    return %c0_i32, %c0_i32_0 : i32, i32
  }
  func.func @transform_7(%arg0: i32) -> (i32, i32) {
    %c0_i32 = arith.constant 0 : i32
    %c0_i32_0 = arith.constant 0 : i32
    %c0_i32_1 = arith.constant 0 : i32
    return %c0_i32, %c0_i32_0 : i32, i32
  }
  func.func @transform_8(%arg0: i32) -> (i32, i32) {
    %c0_i32 = arith.constant 0 : i32
    %c0_i32_0 = arith.constant 0 : i32
    %c0_i32_1 = arith.constant 0 : i32
    return %c0_i32, %c0_i32_0 : i32, i32
  }
  func.func @transform_9(%arg0: i32) -> (i32, i32) {
    %c0_i32 = arith.constant 0 : i32
    %c0_i32_0 = arith.constant 0 : i32
    %c0_i32_1 = arith.constant 0 : i32
    return %c0_i32, %c0_i32_0 : i32, i32
  }
  func.func @transform_10(%arg0: i32) -> (i32, i32) {
    %c0_i32 = arith.constant 0 : i32
    %c0_i32_0 = arith.constant 0 : i32
    %c0_i32_1 = arith.constant 0 : i32
    return %c0_i32, %c0_i32_0 : i32, i32
  }
  func.func @transform_11(%arg0: i32) -> (i32, i32) {
    %c0_i32 = arith.constant 0 : i32
    %c0_i32_0 = arith.constant 0 : i32
    %c0_i32_1 = arith.constant 0 : i32
    return %c0_i32, %c0_i32_0 : i32, i32
  }
  func.func @transform_12(%arg0: i32) -> (i32, i32) {
    %c0_i32 = arith.constant 0 : i32
    %c0_i32_0 = arith.constant 0 : i32
    %c0_i32_1 = arith.constant 0 : i32
    return %c0_i32, %c0_i32_0 : i32, i32
  }
  func.func @transform_13(%arg0: i32) -> (i32, i32, i32) {
    %c0_i32 = arith.constant 0 : i32
    %c0_i32_0 = arith.constant 0 : i32
    %c0_i32_1 = arith.constant 0 : i32
    return %arg0, %c0_i32, %c0_i32_0 : i32, i32, i32
  }
}

</mosaic_0001>

<bundles_post_ra>
// kernel: coop_classifier_forward.6
= control target key start
LH: loop header
LB: loop body
LE: loop exit
PB: predicated region body
PF: predicated region fallthrough
CT: control target
= control target key end

     0   :  { %vm19_vm0 = vcmask 257024   ;;  %v116_v2 = vmov 32.0   ;;  %vm76_vm5 = vcmask 261120   ;;  %s163_s0 = inlined_call_operand.vmem [shape: f32[4,32], index: 0, kind: input, shape index: {}]   ;;  %s164_s1 = inlined_call_operand.vmem [shape: f32[1,32], index: 1, kind: input, shape index: {}]   ;;  %s165_s2 = inlined_call_operand.vmem [shape: f32[1,32], index: 2, kind: input, shape index: {}]   ;;  %s166_s3 = inlined_call_operand.vmem [shape: bf16[32,32], index: 3, kind: input, shape index: {}]   ;;  %s167_s4 = inlined_call_operand.vmem [shape: f32[4,32], index: 4, kind: output, shape index: {}]  }
   0x1   :  { %v18_v0 = vld [vmem:[%s163_s0] sm:$0xf]  ;;  %112 = vrcp.f32 %v116_v2  ;;  %v108_v14 = vld [vmem:[%s166_s3 + $0x8] sm:$0xff] }
   0x2   :  { %v20_v1 = vsel %vm19_vm0, %v18_v0, 0.0  ;;  %86 = vmatpush.bf16.msra.mxu0 %v108_v14  ;;  %v107_v15 = vld [vmem:[%s166_s3] sm:$0xff] }
   0x3   :  { %21 = vadd.xlane.f32.xlu0 %v20_v1  ;;  %v110_v25 = vld [vmem:[%s164_s1] ss:$0 sm:$0xff] }
   0x4   :  { %v111_v28 = vld [vmem:[%s165_s2] ss:$0 sm:$0xff] }
   0x6   :  { %87 = vmatpush.bf16.msra.mxu0 %v107_v15 }
   0x7   :  { %v113_v3 = vpop.eup %112 }
   0x8   :  { %v24_v4 = vmul.f32 32.0, %v113_v3  ;;  %vm28_vm1 = vweird.f32 %v113_v3 }
   0xa   :  { %v25_v5 = vsub.f32 1.0, %v24_v4 }
   0xc   :  { %v26_v6 = vmul.f32 %v113_v3, %v25_v5 }
   0xe   :  { %v27_v7 = vadd.f32 %v113_v3, %v26_v6 }
  0x10   :  { %v29_v8 = vsel %vm28_vm1, %v113_v3, %v27_v7 }
  0x76   :  { %v22_v9 = vpop.xlane.xlu0 %21 }
  0x77   :  { %v30_v10 = vmul.f32 %v29_v8, %v22_v9 }
  0x79   :  { %v31_v11 = vsub.f32 %v18_v0, %v30_v10 }
  0x7b   :  { %v32_v12 = vmul.f32 %v31_v11, %v31_v11 }
  0x7d   :  { %v33_v13 = vsel %vm19_vm0, %v32_v12, 0.0 }
  0x7e   :  { %34 = vadd.xlane.f32.xlu0 %v33_v13 }
  0xf1   :  { %v35_v16 = vpop.xlane.xlu0 %34 }
  0xf2   :  { %v36_v17 = vmul.f32 %v35_v16, %v29_v8 }
  0xf4   :  { %v37_v18 = vadd.f32 1e-05, %v36_v17 }
  0xf6   :  { %114 = vrsqrt.f32 %v37_v18  ;;  %vm44_vm3 = vweird.f32 %v37_v18 }
  0xfc   :  { %v115_v19 = vpop.eup %114 }
  0xfd   :  { %v39_v20 = vmul.f32 %v115_v19, %v37_v18  ;;  %vm45_vm2 = vweird.f32 %v115_v19 }
  0xfe   :  { %vm46_vm4 = vmor %vm44_vm3, %vm45_vm2 }
  0xff   :  { %v40_v21 = vmul.f32 %v115_v19, %v39_v20 }
 0x101   :  { %v41_v22 = vmul.f32 0.5, %v40_v21 }
 0x103   :  { %v42_v23 = vsub.f32 1.5, %v41_v22 }
 0x105   :  { %v43_v24 = vmul.f32 %v115_v19, %v42_v23 }
 0x107   :  { %v47_v26 = vsel %vm46_vm4, %v115_v19, %v43_v24 }
 0x108   :  { %v48_v27 = vmul.f32 %v47_v26, %v31_v11 }
 0x10a   :  { %v53_v29 = vmul.f32 %v110_v25, %v48_v27 }
 0x10c   :  { %v58_v30 = vadd.f32 %v111_v28, %v53_v29 }
 0x10e   :  { %v59_v31 = vpack.c.bf16 %v58_v30, %v58_v30 }
 0x110   :  { %106 = vmatmul.msk.bf16.vlgmr.msra.gmra.mxu0 %vm76_vm5, %v59_v31 }
 0x18d   :  { %v89_v32 = vpop.f32.mrf.mxu0 }
 0x18e   :  { %93 = vst.msk [vmem:[%s167_s4] sm:$0xf] %vm19_vm0, %v89_v32 }
 0x195   :  { %v91_v33 = vpop.f32.mrf.mxu0 }

// kernel: coop_classifier_forward.7
= control target key start
LH: loop header
LB: loop body
LE: loop exit
PB: predicated region body
PF: predicated region fallthrough
CT: control target
= control target key end

     0   :  { %vm37_vm0 = vcmask 257024   ;;  %s161_s0 = inlined_call_operand.vmem [shape: f32[2,32], index: 0, kind: input, shape index: {}]   ;;  %s162_s1 = inlined_call_operand.vmem [shape: f32[4,32], index: 1, kind: input, shape index: {}]   ;;  %s163_s2 = inlined_call_operand.<no memory space> [shape: f32[1], index: 2, kind: input, shape index: {}]   ;;  %s164_s3 = inlined_call_operand.hbm [shape: f32[2,4], index: 3, kind: output, shape index: {}]  }
   0x1   :  { %v18_v0 = vld [vmem:[%s162_s1] sm:$0xf] }
   0x2   :  { %v36_v1 = vmul.f32 %v18_v0, %v18_v0 }
   0x3   :  { %9 = vsyncpa [#allocation4], 0  ;;  %v17_v2 = vld [vmem:[%s161_s0] sm:$0x3]  ;;  %vm20_vm1 = vcmask 254976   ;;  %vm55_vm5 = vcmask 261120   ;;  %v76_v29 = vstv %s163_s2 }
   0x4   :  { %v38_v3 = vsel %vm37_vm0, %v36_v1, 0.0  ;;  %v19_v4 = vmul.f32 %v17_v2, %v17_v2  ;;  %s128_s16 = smov [#allocation3]   ;;  %s87_s20 = sshll.u32 %s164_s3, 4  ;;  %vm78_vm9 = vcmask 25600   ;;  %s88_s20 = int_to_ptr.hbm [resolvable:$true] %s87_s20 }
   0x5   :  { %39 = vadd.xlane.f32.xlu0 %v38_v3  ;;  %s85_s17 = sshll.u32 %s128_s16, 4  ;;  %s86_s17 = int_to_ptr.vmem [resolvable:$true] %s85_s17 }
   0x6   :  { %v21_v5 = vsel %vm20_vm1, %v19_v4, 0.0 }
   0xd   :  { %22 = vadd.xlane.f32.xlu0 %v21_v5 }
  0x78   :  { %v40_v6 = vpop.xlane.xlu0 %39 }
  0x79   :  { %v41_v7 = vadd.f32 1e-12, %v40_v6 }
  0x7b   :  { %98 = vrsqrt.f32 %v41_v7  ;;  %vm48_vm3 = vweird.f32 %v41_v7 }
  0x80   :  { %v23_v8 = vpop.xlane.xlu0 %22 }
  0x81   :  { %v99_v9 = vpop.eup %98  ;;  %v24_v10 = vadd.f32 1e-12, %v23_v8 }
  0x82   :  { %v43_v11 = vmul.f32 %v99_v9, %v41_v7  ;;  %vm49_vm2 = vweird.f32 %v99_v9 }
  0x83   :  { %100 = vrsqrt.f32 %v24_v10  ;;  %vm50_vm4 = vmor %vm48_vm3, %vm49_vm2  ;;  %vm31_vm7 = vweird.f32 %v24_v10 }
  0x84   :  { %v44_v12 = vmul.f32 %v99_v9, %v43_v11 }
  0x86   :  { %v45_v13 = vmul.f32 0.5, %v44_v12 }
  0x88   :  { %v46_v14 = vsub.f32 1.5, %v45_v13 }
  0x89   :  { %v101_v15 = vpop.eup %100 }
  0x8a   :  { %v26_v16 = vmul.f32 %v101_v15, %v24_v10  ;;  %v47_v17 = vmul.f32 %v99_v9, %v46_v14  ;;  %vm32_vm6 = vweird.f32 %v101_v15 }
  0x8b   :  { %vm33_vm8 = vmor %vm31_vm7, %vm32_vm6 }
  0x8c   :  { %v27_v18 = vmul.f32 %v101_v15, %v26_v16  ;;  %v51_v19 = vsel %vm50_vm4, %v99_v9, %v47_v17 }
  0x8d   :  { %v52_v20 = vmul.f32 %v51_v19, %v18_v0 }
  0x8e   :  { %v28_v21 = vmul.f32 0.5, %v27_v18 }
  0x8f   :  { %v54_v22 = vpack.c.bf16 %v52_v20, %v52_v20 }
  0x90   :  { %v29_v23 = vsub.f32 1.5, %v28_v21 }
  0x91   :  { %v60_v24 = vsel %vm55_vm5, %v54_v22, 0 }
  0x92   :  { %v30_v25 = vmul.f32 %v101_v15, %v29_v23  ;;  %69 = vmatpush.bf16.xpose.msra.mxu0 %v60_v24 }
  0x94   :  { %v34_v26 = vsel %vm33_vm8, %v101_v15, %v30_v25 }
  0x95   :  { %v35_v27 = vmul.f32 %v34_v26, %v17_v2 }
  0x97   :  { %v53_v28 = vpack.c.bf16 %v35_v27, %v35_v27 }
  0x99   :  { %96 = vmatmul.msk.bf16.vlgmr.msra.gmra.mxu0 %vm55_vm5, %v53_v28 }
 0x116   :  { %v71_v30 = vpop.f32.mrf.mxu0 }
 0x117   :  { %v77_v31 = vmul.f32 %v76_v29, %v71_v30 }
 0x119   :  { %79 = vst.msk [vmem:[#allocation3] sm:$0x3] %vm78_vm9, %v77_v31 }
 0x11a   :  { %90 = dma.vmem_to_hbm [thread:$0]  %s86_s17, 32, %s88_s20, [#allocation4]  }
 0x11e   :  { %v73_v32 = vpop.f32.mrf.mxu0 }
 0x11f   :  { %126 = dma.done.wait [#allocation4], 32  }
 0x120   :  { %127 = vsyncadd [#allocation4], 4294967264 }
 0x121   :  { %95 = vsyncpa [#allocation4], 1 }

// kernel: coop_classifier_forward.4
= control target key start
LH: loop header
LB: loop body
LE: loop exit
PB: predicated region body
PF: predicated region fallthrough
CT: control target
= control target key end

     0   :  { %s1122_s25 = smov 0   ;;  %s1251_s0 = inlined_call_operand.vmem [shape: f32[4,8,32], index: 0, kind: input, shape index: {}]   ;;  %s1252_s1 = inlined_call_operand.vmem [shape: f32[1,32], index: 1, kind: input, shape index: {}]   ;;  %s1253_s2 = inlined_call_operand.vmem [shape: f32[1,32], index: 2, kind: input, shape index: {}]   ;;  %s1254_s3 = inlined_call_operand.vmem [shape: bf16[32,96], index: 3, kind: input, shape index: {}]   ;;  %s1255_s4 = inlined_call_operand.vmem [shape: f32[1,96], index: 4, kind: input, shape index: {}]   ;;  %s1256_s5 = inlined_call_operand.vmem [shape: bf16[32,32], index: 5, kind: input, shape index: {}]   ;;  %s1257_s6 = inlined_call_operand.vmem [shape: f32[1,32], index: 6, kind: input, shape index: {}]   ;;  %s1258_s7 = inlined_call_operand.vmem [shape: f32[1,32], index: 7, kind: input, shape index: {}]   ;;  %s1259_s8 = inlined_call_operand.vmem [shape: f32[1,32], index: 8, kind: input, shape index: {}]   ;;  %s1260_s9 = inlined_call_operand.vmem [shape: bf16[32,128], index: 9, kind: input, shape index: {}]   ;;  %s1261_s10 = inlined_call_operand.vmem [shape: f32[1,128], index: 10, kind: input, shape index: {}]   ;;  %s1262_s11 = inlined_call_operand.vmem [shape: bf16[128,32], index: 11, kind: input, shape index: {}]   ;;  %s1263_s12 = inlined_call_operand.vmem [shape: f32[1,32], index: 12, kind: input, shape index: {}]   ;;  %s1264_s13 = inlined_call_operand.vmem [shape: f32[4,8,32], index: 13, kind: output, shape index: {}]  }
   0x1 LB: > { %s909_s26 = sadd.s32 4294967295, %s1043_s25   ;;  %p913_p0 = scmp.ge.s32.totalorder %s1043_s25, 1  ;;  %s1043_s25 = sphi %s1122_s25, %s23_s25  }
   0x2   : > { %p386_p1 = scmp.lt.s32.totalorder %s1043_s25, 5 }
   0x4   : > { %p387_p2 = pnand %p913_p0, %p386_p1 }
   0x5   : > { %p428_p3 = scmp.lt.s32.totalorder (!%p387_p2), %s909_s26, 3  ;;  %s1046_s24 = smov (!%p387_p2), 80  }
   0x6   : > { %390 = sbr.rel (%p387_p2) target bundleno = 2283 (0x8eb), region = 72  ;;  %s1047_s28 = smov (!%p387_p2), 64  }
   0x7   : > { %s1048_s29 = smov (!%p387_p2), 96   ;;  %s1050_s14 = smov (!%p387_p2), 112  }
   0x8   : > { %s1051_s19 = smov (!%p387_p2), 16  }
   0xb   : > { %s1266_s26 = smov (!%p428_p3, %s909_s26), 3  ;;  %vm440_vm0 = vcmask 261120   ;;  %v1045_v2 = vmov 32.0   ;;  %v983_v14 = vld [vmem:[%s1254_s3 + $0x8] sm:$0xff]  ;;  %v982_v15 = vld [vmem:[%s1254_s3] sm:$0xff]  ;;  %vm564_vm5 = vcmask 1043456   ;;  %v515_v43 = vlaneseq }
   0xc   : > { %s914_s27 = sshll.u32 %s1266_s26, 3  ;;  %1019 = vrcp.f32 %v1045_v2  ;;  %508 = vmatpush.bf16.msra.mxu0 %v983_v14  ;;  %v1011_v25 = vld [vmem:[%s1252_s1] ss:$0 sm:$0xff]  ;;  %vm524_vm6 = vcmask 130048   ;;  %vm546_vm8 = vcmask 64512  }
   0xd   : > { %s431_s30 = scalar_lea.vmem %s1251_s0, %s914_s27  ;;  %v1012_v28 = vld [vmem:[%s1253_s2] ss:$0 sm:$0xff]  ;;  %v516_v44 = vshrl.u32 %v515_v43, 7  ;;  %v518_v45 = vand.u32 127, %v515_v43 }
   0xe   : > { %v1138_v0 = vld [vmem:[%s431_s30] sm:$0xff]  ;;  %s1049_s30 = smov 48  }
   0xf   : > { %v441_v1 = vsel %vm440_vm0, %v1138_v0, 0.0  ;;  %v1013_v32 = vld [vmem:[%s1255_s4] ss:$0 sm:$0xff]  ;;  %vm519_vm7 = vcmp.le.s32.totalorder %v518_v45, %v516_v44 }
  0x10   : > { %442 = vadd.xlane.f32.xlu0 %v441_v1  ;;  %509 = vmatpush.bf16.msra.mxu0 %v982_v15  ;;  %v1015_v45 = vld [vmem:[%s1258_s7] ss:$0 sm:$0xff] }
  0x12   : > { %v1020_v3 = vpop.eup %1019 }
  0x13   : > { %v445_v4 = vmul.f32 32.0, %v1020_v3  ;;  %vm449_vm1 = vweird.f32 %v1020_v3 }
  0x15   : > { %v446_v5 = vsub.f32 1.0, %v445_v4 }
  0x17   : > { %v447_v6 = vmul.f32 %v1020_v3, %v446_v5 }
  0x19   : > { %v448_v7 = vadd.f32 %v1020_v3, %v447_v6 }
  0x1b   : > { %v1142_v8 = vsel %vm449_vm1, %v1020_v3, %v448_v7 }
  0x83   : > { %v443_v9 = vpop.xlane.xlu0 %442 }
  0x84   : > { %v451_v10 = vmul.f32 %v1142_v8, %v443_v9 }
  0x86   : > { %v452_v11 = vsub.f32 %v1138_v0, %v451_v10 }
  0x88   : > { %v453_v12 = vmul.f32 %v452_v11, %v452_v11 }
  0x8a   : > { %v454_v13 = vsel %vm440_vm0, %v453_v12, 0.0 }
  0x8b   : > { %455 = vadd.xlane.f32.xlu0 %v454_v13 }
  0xfe   : > { %v456_v16 = vpop.xlane.xlu0 %455 }
  0xff   : > { %v457_v17 = vmul.f32 %v456_v16, %v1142_v8 }
 0x101   : > { %v458_v18 = vadd.f32 1e-05, %v457_v17  ;;  %v985_v17 = vld [vmem:[%s1256_s5 + $0x8] sm:$0xff] }
 0x102   : > { %674 = vmatpush.bf16.msrb.mxu0 %v985_v17  ;;  %v1018_v17 = vld [vmem:[%s1263_s12] ss:$0 sm:$0xff] }
 0x103   : > { %1021 = vrsqrt.f32 %v458_v18  ;;  %vm465_vm3 = vweird.f32 %v458_v18 }
 0x109   : > { %v1022_v19 = vpop.eup %1021 }
 0x10a   : > { %v460_v20 = vmul.f32 %v1022_v19, %v458_v18  ;;  %vm466_vm2 = vweird.f32 %v1022_v19  ;;  %v984_v18 = vld [vmem:[%s1256_s5] sm:$0xff] }
 0x10b   : > { %vm467_vm4 = vmor %vm465_vm3, %vm466_vm2  ;;  %675 = vmatpush.bf16.msrb.mxu0 %v984_v18 }
 0x10c   : > { %v461_v21 = vmul.f32 %v1022_v19, %v460_v20 }
 0x10e   : > { %v462_v22 = vmul.f32 0.5, %v461_v21 }
 0x110   : > { %v463_v23 = vsub.f32 1.5, %v462_v22 }
 0x112   : > { %v464_v24 = vmul.f32 %v1022_v19, %v463_v23 }
 0x114   : > { %v468_v26 = vsel %vm467_vm4, %v1022_v19, %v464_v24  ;;  %v1014_v24 = vld [vmem:[%s1257_s6] ss:$0 sm:$0xff] }
 0x115   : > { %v469_v27 = vmul.f32 %v468_v26, %v452_v11 }
 0x117   : > { %v473_v29 = vmul.f32 %v1011_v25, %v469_v27 }
 0x119   : > { %v477_v30 = vadd.f32 %v1012_v28, %v473_v29 }
 0x11b   : > { %v478_v31 = vpack.c.bf16 %v477_v30, %v477_v30 }
 0x11d   : > { %924 = vmatmul.msk.bf16.vlgmr.msra.gmra.mxu0 %vm440_vm0, %v478_v31 }
 0x19a   : > { %v511_v33 = vpop.f32.mrf.mxu0 }
 0x19b   : > { %v512_v34 = vadd.f32 %v1013_v32, %v511_v33 }
 0x19d   : > { %v520_v35 = vpack.c.bf16 %v512_v34, %v512_v34 }
 0x19f   : > { %583 = vrot.lane.b32.xlu0 %v520_v35, %s1046_s24  ;;  %559 = vrot.lane.b32.xlu2 %v520_v35, %s1047_s28  ;;  %s435_s24 = scalar_lea.vmem %s1264_s13, %s914_s27 }
 0x1a0   : > { %522 = vrot.lane.b32.xlu1 %v520_v35, %s1048_s29 }
 0x1a2   : > { %v513_v36 = vpop.f32.mrf.mxu0 }
 0x1f9   : > { %v560_v37 = vpop.permute.xlu2 %559 }
 0x1fa   : > { %v566_v38 = vsel %vm564_vm5, %v560_v37, 0 }
 0x1fb   : > { %575 = vmatpush.bf16.msra.mxu2 %v566_v38 }
 0x211   : > { %v584_v39 = vpop.permute.xlu0 %583 }
 0x212   : > { %v523_v40 = vpop.permute.xlu1 %522  ;;  %v589_v41 = vsel %vm524_vm6, %v584_v39, 0 }
 0x213   : > { %v529_v42 = vsel %vm524_vm6, %v523_v40, 0  ;;  %598 = vmatpush.bf16.xpose.msrb.mxu2 %v589_v41 }
 0x214   : > { %538 = vmatpush.bf16.xpose.msra.mxu1 %v529_v42 }
 0x21b   : > { %925 = vmatmul.msk.bf16.vlgmr.msra.gmra.mxu1 %vm524_vm6, %v520_v35 }
 0x298   : > { %v540_v46 = vpop.f32.mrf.mxu1 }
 0x299   : > { %v544_v47 = vmul.f32 0.25, %v540_v46 }
 0x29b   : > { %v545_v48 = vsel %vm519_vm7, %v544_v47, -1e+30 }
 0x29c   : > { %v547_v49 = vsel %vm546_vm8, %v545_v48, -inf }
 0x29d   : > { %548 = vmax.xlane.f32.xlu1 %v547_v49 }
 0x2a0   : > { %v542_v50 = vpop.f32.mrf.mxu1 }
 0x2b6   : > { %618 = vrot.lane.b32.xlu1 %v520_v35, %s1049_s30 }
 0x310   : > { %v549_v51 = vpop.xlane.xlu1 %548 }
 0x311   : > { %v550_v52 = vsub.f32 %v545_v48, %v549_v51  ;;  %v995_v51 = vld [vmem:[%s1262_s11 + $0x38] sm:$0xff] }
 0x312   : > { %841 = vmatpush.bf16.msra.mxu3 %v995_v51 }
 0x313   : > { %v551_v53 = vmul.f32 1.442695, %v550_v52  ;;  %v994_v52 = vld [vmem:[%s1262_s11 + $0x30] sm:$0xff] }
 0x315   : > { %1023 = vpow2.f32 %v551_v53  ;;  %v993_v53 = vld [vmem:[%s1262_s11 + $0x28] sm:$0xff] }
 0x316   : > { %842 = vmatpush.bf16.msra.mxu3 %v994_v52 }
 0x31a   : > { %843 = vmatpush.bf16.msra.mxu3 %v993_v53 }
 0x31b   : > { %v1024_v54 = vpop.eup %1023 }
 0x31c   : > { %v553_v55 = vsel %vm546_vm8, %v1024_v54, 0.0 }
 0x31d   : > { %554 = vadd.xlane.f32.xlu2 %v553_v55  ;;  %v991_v55 = vld [vmem:[%s1262_s11 + $0x18] sm:$0xff] }
 0x328   : > { %v619_v59 = vpop.permute.xlu1 %618 }
 0x329   : > { %v624_v61 = vsel %vm564_vm5, %v619_v59, 0  ;;  %v988_v59 = vld [vmem:[%s1262_s11] sm:$0xff] }
 0x335   : > { %581 = vrot.lane.b32.xlu2 %v520_v35, %s1050_s14  ;;  %v987_v35 = vld [vmem:[%s1260_s9 + $0x8] sm:$0xff] }
 0x336   : > { %744 = vmatpush.bf16.msrb.mxu1 %v987_v35 }
 0x390   : > { %v555_v56 = vpop.xlane.xlu2 %554 }
 0x391   : > { %1025 = vrcp.f32 %v555_v56  ;;  %v990_v56 = vld [vmem:[%s1262_s11 + $0x10] sm:$0xff] }
 0x397   : > { %v1026_v57 = vpop.eup %1025 }
 0x398   : > { %v557_v58 = vmul.f32 %v1026_v57, %v1024_v54  ;;  %v582_v62 = vpop.permute.xlu2 %581  ;;  %v992_v54 = vld [vmem:[%s1262_s11 + $0x20] sm:$0xff]  ;;  %v989_v57 = vld [vmem:[%s1262_s11 + $0x8] sm:$0xff] }
 0x399   : > { %844 = vmatpush.bf16.msra.mxu3 %v992_v54 }
 0x39a   : > { %v558_v60 = vpack.c.bf16 %v557_v58, %v557_v58  ;;  %v1017_v58 = vld [vmem:[%s1261_s10] ss:$0 sm:$0xff] }
 0x39c   : > { %926 = vmatmul.msk.bf16.vlgmr.msra.gmra.mxu2 %vm546_vm8, %v558_v60 }
 0x39d   : > { %633 = vmatpush.bf16.msra.mxu2 %v624_v61  ;;  %845 = vmatpush.bf16.msra.mxu3 %v991_v55 }
 0x3a1   : > { %846 = vmatpush.bf16.msra.mxu3 %v990_v56 }
 0x3a5   : > { %847 = vmatpush.bf16.msra.mxu3 %v989_v57 }
 0x3a9   : > { %848 = vmatpush.bf16.msra.mxu3 %v988_v59 }
 0x3ac   : > { %927 = vmatmul.msk.bf16.vlgmr.msrb.gmra.mxu2 %vm524_vm6, %v582_v62 }
 0x41f   : > { %v577_v63 = vpop.f32.mrf.mxu2 }
 0x427   : > { %v579_v1 = vpop.f32.mrf.mxu2 }
 0x42f   : > { %v600_v2 = vpop.f32.mrf.mxu2 }
 0x430   : > { %v604_v3 = vmul.f32 0.25, %v600_v2 }
 0x432   : > { %v605_v4 = vsel %vm519_vm7, %v604_v3, -1e+30 }
 0x433   : > { %v606_v5 = vsel %vm546_vm8, %v605_v4, -inf }
 0x434   : > { %607 = vmax.xlane.f32.xlu0 %v606_v5 }
 0x437   : > { %v602_v6 = vpop.f32.mrf.mxu2 }
 0x4a7   : > { %v608_v7 = vpop.xlane.xlu0 %607 }
 0x4a8   : > { %v609_v9 = vsub.f32 %v605_v4, %v608_v7 }
 0x4aa   : > { %v610_v10 = vmul.f32 1.442695, %v609_v9 }
 0x4ac   : > { %1027 = vpow2.f32 %v610_v10 }
 0x4b2   : > { %v1028_v11 = vpop.eup %1027 }
 0x4b3   : > { %v612_v12 = vsel %vm546_vm8, %v1028_v11, 0.0 }
 0x4b4   : > { %613 = vadd.xlane.f32.xlu2 %v612_v12 }
 0x527   : > { %v614_v13 = vpop.xlane.xlu2 %613 }
 0x528   : > { %1029 = vrcp.f32 %v614_v13 }
 0x52e   : > { %v1030_v14 = vpop.eup %1029 }
 0x52f   : > { %v616_v15 = vmul.f32 %v1030_v14, %v1028_v11 }
 0x531   : > { %v617_v16 = vpack.c.bf16 %v616_v15, %v616_v15 }
 0x533   : > { %928 = vmatmul.msk.bf16.vlgmr.msra.gmra.mxu2 %vm546_vm8, %v617_v16 }
 0x5b6   : > { %v635_v19 = vpop.f32.mrf.mxu2 }
 0x5b7   : > { %640 = vrot.lane.b32.xlu1 %v635_v19, %s1051_s19 }
 0x5be   : > { %v637_v20 = vpop.f32.mrf.mxu2 }
 0x629   : > { %v641_v21 = vpop.permute.xlu1 %640 }
 0x62a   : > { %v643_v22 = vsel %vm524_vm6, %v577_v63, %v641_v21 }
 0x62b   : > { %v644_v23 = vpack.c.bf16 %v643_v22, %v643_v22 }
 0x62d   : > { %937 = vmatmul.msk.bf16.vlgmr.msrb.gmra.mxu0 %vm440_vm0, %v644_v23 }
 0x6aa   : > { %v677_v25 = vpop.f32.mrf.mxu0 }
 0x6ab   : > { %v678_v26 = vadd.f32 %v1014_v24, %v677_v25 }
 0x6ad   : > { %v1190_v27 = vadd.f32 %v678_v26, %v1138_v0  ;;  %v986_v0 = vld [vmem:[%s1260_s9] sm:$0xff] }
 0x6ae   : > { %745 = vmatpush.bf16.msrb.mxu1 %v986_v0 }
 0x6af   : > { %v684_v28 = vsel %vm440_vm0, %v1190_v27, 0.0 }
 0x6b0   : > { %685 = vadd.xlane.f32.xlu0 %v684_v28 }
 0x6b2   : > { %v679_v29 = vpop.f32.mrf.mxu0 }
 0x723   : > { %v686_v30 = vpop.xlane.xlu0 %685 }
 0x724   : > { %v687_v31 = vmul.f32 %v686_v30, %v1142_v8 }
 0x726   : > { %v688_v32 = vsub.f32 %v1190_v27, %v687_v31 }
 0x728   : > { %v689_v33 = vmul.f32 %v688_v32, %v688_v32 }
 0x72a   : > { %v690_v34 = vsel %vm440_vm0, %v689_v33, 0.0 }
 0x72b   : > { %691 = vadd.xlane.f32.xlu2 %v690_v34 }
 0x79e   : > { %v692_v36 = vpop.xlane.xlu2 %691 }
 0x79f   : > { %v693_v37 = vmul.f32 %v692_v36, %v1142_v8  ;;  %v1016_v8 = vld [vmem:[%s1259_s8] ss:$0 sm:$0xff] }
 0x7a1   : > { %v694_v38 = vadd.f32 1e-05, %v693_v37 }
 0x7a3   : > { %1031 = vrsqrt.f32 %v694_v38  ;;  %vm701_vm10 = vweird.f32 %v694_v38 }
 0x7a9   : > { %v1032_v39 = vpop.eup %1031 }
 0x7aa   : > { %v696_v40 = vmul.f32 %v1032_v39, %v694_v38  ;;  %vm702_vm9 = vweird.f32 %v1032_v39 }
 0x7ab   : > { %vm703_vm11 = vmor %vm701_vm10, %vm702_vm9 }
 0x7ac   : > { %v697_v41 = vmul.f32 %v1032_v39, %v696_v40 }
 0x7ae   : > { %v698_v42 = vmul.f32 0.5, %v697_v41 }
 0x7b0   : > { %v699_v43 = vsub.f32 1.5, %v698_v42 }
 0x7b2   : > { %v700_v44 = vmul.f32 %v1032_v39, %v699_v43 }
 0x7b4   : > { %v704_v46 = vsel %vm703_vm11, %v1032_v39, %v700_v44 }
 0x7b5   : > { %v705_v47 = vmul.f32 %v704_v46, %v688_v32 }
 0x7b7   : > { %v709_v48 = vmul.f32 %v1015_v45, %v705_v47 }
 0x7b9   : > { %v713_v49 = vadd.f32 %v1016_v8, %v709_v48 }
 0x7bb   : > { %v714_v50 = vpack.c.bf16 %v713_v49, %v713_v49 }
 0x7bd   : > { %946 = vmatmul.msk.bf16.vlgmr.msrb.gmra.mxu1 %vm440_vm0, %v714_v50 }
 0x83a   : > { %v747_v60 = vpop.f32.mrf.mxu1 }
 0x83b   : > { %v748_v61 = vadd.f32 %v1017_v58, %v747_v60 }
 0x83d   : > { %v947_v62 = vmul.f32 -1.702, %v748_v61 }
 0x83f   : > { %v753_v63 = vmul.f32 1.442695, %v947_v62 }
 0x841   : > { %1033 = vpow2.f32 %v753_v63 }
 0x842   : > { %v749_v1 = vpop.f32.mrf.mxu1 }
 0x847   : > { %v1034_v2 = vpop.eup %1033 }
 0x848   : > { %v755_v3 = vadd.f32 1.0, %v1034_v2 }
 0x84a   : > { %1035 = vrcp.f32 %v755_v3  ;;  %v767_v7 = vand.u32 2147483648, %v755_v3  ;;  %v765_v10 = vand.u32 2147483647, %v755_v3  ;;  %vm761_vm13 = vweird.f32 %v755_v3 }
 0x84c   : > { %v768_v12 = vor.u32 1.1754944e-38, %v767_v7  ;;  %vm766_vm15 = vcmp.eq.f32.partialorder %v765_v10, 8.507059e+37 }
 0x850   : > { %v1036_v4 = vpop.eup %1035 }
 0x851   : > { %v757_v5 = vmul.f32 %v1036_v4, %v755_v3  ;;  %vm762_vm12 = vweird.f32 %v1036_v4 }
 0x852   : > { %vm763_vm14 = vmor %vm761_vm13, %vm762_vm12 }
 0x853   : > { %v758_v6 = vsub.f32 1.0, %v757_v5 }
 0x855   : > { %v759_v9 = vmul.f32 %v1036_v4, %v758_v6 }
 0x857   : > { %v760_v11 = vadd.f32 %v1036_v4, %v759_v9 }
 0x859   : > { %v764_v13 = vsel %vm763_vm14, %v1036_v4, %v760_v11 }
 0x85a   : > { %v769_v14 = vsel %vm766_vm15, %v768_v12, %v764_v13 }
 0x85b   : > { %v771_v15 = vmul.f32 %v769_v14, %v748_v61 }
 0x85d   : > { %v772_v16 = vpack.c.bf16 %v771_v15, %v771_v15 }
 0x85f   : > { %849 = vmatmul.bf16.vlgmr.msra.gmra.mxu3 %v772_v16 }
 0x8e2   : > { %v850_v18 = vpop.f32.mrf.mxu3 }
 0x8e3   : > { %v851_v19 = vadd.f32 %v1018_v17, %v850_v18 }
 0x8e5   : > { %v854_v20 = vadd.f32 %v851_v19, %v1190_v27 }
 0x8e7   : > { %855 = vst.msk [vmem:[%s435_s24] sm:$0xff] %vm440_vm0, %v854_v20 }
 0x8ea   : > { %v852_v21 = vpop.f32.mrf.mxu3 }
 0x8eb PF: > { %s23_s25 = sadd.s32 1, %s1043_s25  }
 0x8ec   : > { %p20_p4 = scmp.ge.s32.totalorder %s23_s25, 6  }
 0x8ee   :  { %22 = sbr.rel (!%p20_p4) target bundleno = 1 (0x1), region = 102 }

</bundles_post_ra>
